<compile_context>
chip_gen: v5e
topology: v5e:2x2
jax: 0.10.0
libtpu: 0.0.40
codegen_flags: <defaults>
</compile_context>

<pallas_src>
import functools

import jax
import jax.numpy as jnp
from jax.experimental import pallas as pl
from jax.experimental.pallas import tpu as pltpu


def _actor_kernel(x_ref, w_ref, b_ref, o_ref, *, n_states, n_actions, max_actions):
    """One batch tile of the Actor forward pass.

    x_ref: (n_states, TB)   activations, batch in lanes
    w_ref: (4, H, H)        slot0 = W1 (H, n_states)-padded, slot1 = W2, slot2 = W3,
                            slot3 = W4^T (H, n_actions)-padded   (all (out,in)/transposed)
    b_ref: (H, 4)           column j = bias of layer j+1 (b4 padded to H rows)
    o_ref: (n_actions, TB)
    """
    x = x_ref[...]                                        # (n_states, TB)

    # ---- Layer 1: Linear(n_states -> H) as n_states broadcast FMAs (VPU) ----
    w1 = w_ref[0]                                         # (H, H), first n_states cols valid
    acc = w1[:, 0:1] * x[0:1, :]                          # (H,1)*(1,TB) -> (H,TB)
    for k in range(1, n_states):
        acc = acc + w1[:, k:k + 1] * x[k:k + 1, :]
    h = jnp.maximum(acc + b_ref[:, 0:1], 0.0)             # (H, TB)

    # ---- Layers 2 & 3: H x H matmuls on the MXU ----
    h = jnp.maximum(
        jnp.dot(w_ref[1], h, preferred_element_type=jnp.float32) + b_ref[:, 1:2], 0.0)
    h = jnp.maximum(
        jnp.dot(w_ref[2], h, preferred_element_type=jnp.float32) + b_ref[:, 2:3], 0.0)

    # ---- Layer 4: Linear(H -> n_actions) as mul + cross-sublane sum (VPU+XLU) ----
    w4t = w_ref[3]                                        # (H, H), first n_actions cols valid
    rows = []
    for a in range(n_actions):
        za = jnp.sum(w4t[:, a:a + 1] * h, axis=0, keepdims=True)   # (1, TB)
        rows.append(za + b_ref[a:a + 1, 3:4])
    out = rows[0] if n_actions == 1 else jnp.concatenate(rows, axis=0)  # (n_actions, TB)

    o_ref[...] = jnp.tanh(out) * max_actions


def actor_forward(x, w_slab, b_slab, n_states, n_actions,
                  max_actions=1.0, batch_tile=512):
    """Actor forward pass. x: (B, n_states) f32 -> (B, n_actions) f32."""
    B = x.shape[0]
    x_t = jnp.transpose(x).astype(jnp.float32)            # (n_states, B): batch in lanes

    kernel = functools.partial(
        _actor_kernel, n_states=int(n_states), n_actions=int(n_actions),
        max_actions=float(max_actions))

    if B <= batch_tile:
        # Small batch: no grid, every operand is a full-array VMEM block.
        out_t = pl.pallas_call(
            kernel,
            out_shape=jax.ShapeDtypeStruct((n_actions, B), jnp.float32),
            in_specs=[pl.BlockSpec(memory_space=pltpu.MemorySpace.VMEM)] * 3,
            out_specs=pl.BlockSpec(memory_space=pltpu.MemorySpace.VMEM),
        )(x_t, w_slab, b_slab)
        return jnp.transpose(out_t)

    # Large batch: 1-D grid over batch tiles (lane tile, multiple of 128).
    TB = max(128, ((int(batch_tile) + 127) // 128) * 128)
    n_tiles = pl.cdiv(B, TB)
    Bp = n_tiles * TB
    if Bp != B:
        x_t = jnp.pad(x_t, ((0, 0), (0, Bp - B)))

    out_t = pl.pallas_call(
        kernel,
        out_shape=jax.ShapeDtypeStruct((n_actions, Bp), jnp.float32),
        grid=(n_tiles,),
        in_specs=[
            pl.BlockSpec((n_states, TB), lambda i: (0, i)),       # streamed batch tile
            pl.BlockSpec(w_slab.shape, lambda i: (0, 0, 0)),      # weights stay resident
            pl.BlockSpec(b_slab.shape, lambda i: (0, 0)),         # biases stay resident
        ],
        out_specs=pl.BlockSpec((n_actions, TB), lambda i: (0, i)),
        compiler_params=pltpu.CompilerParams(
            dimension_semantics=("parallel",)),                   # 2x on v7x dual-TC
    )(x_t, w_slab, b_slab)
    return jnp.transpose(out_t[:, :B])


def init_actor_params(key, n_states, n_actions, hidden=32):
    """PyTorch-style Linear params: W (out, in), b (out,), U(-1/sqrt(fan_in), +)."""
    dims = [(n_states, hidden), (hidden, hidden), (hidden, hidden), (hidden, n_actions)]
    params = {}
    for idx, (fan_in, fan_out) in enumerate(dims, start=1):
        key, kw, kb = jax.random.split(key, 3)
        bound = 1.0 / float(fan_in) ** 0.5
        params[f"w{idx}"] = jax.random.uniform(
            kw, (fan_out, fan_in), jnp.float32, minval=-bound, maxval=bound)
        params[f"b{idx}"] = jax.random.uniform(
            kb, (fan_out,), jnp.float32, minval=-bound, maxval=bound)
    return params


def pack_actor_params(params):
    """Pack 8 PyTorch-layout tensors into 2 kernel operands."""
    w1, w2, w3, w4 = params["w1"], params["w2"], params["w3"], params["w4"]
    b1, b2, b3, b4 = params["b1"], params["b2"], params["b3"], params["b4"]
    H = w2.shape[0]
    n_states = w1.shape[1]
    n_actions = w4.shape[0]
    assert n_states <= H and n_actions <= H, "packing assumes n_states, n_actions <= hidden"

    w_slab = jnp.zeros((4, H, H), jnp.float32)
    w_slab = w_slab.at[0, :, :n_states].set(w1)        # W1 (H, n_states)
    w_slab = w_slab.at[1].set(w2)                      # W2 (H, H)
    w_slab = w_slab.at[2].set(w3)                      # W3 (H, H)
    w_slab = w_slab.at[3, :, :n_actions].set(w4.T)     # W4^T (H, n_actions)

    b_slab = jnp.zeros((H, 4), jnp.float32)
    b_slab = b_slab.at[:, 0].set(b1)
    b_slab = b_slab.at[:, 1].set(b2)
    b_slab = b_slab.at[:, 2].set(b3)
    b_slab = b_slab.at[:n_actions, 3].set(b4)
    return w_slab, b_slab, n_states, n_actions


def ref_forward(x, params, max_actions):
    h = jnp.maximum(x @ params["w1"].T + params["b1"], 0.0)
    h = jnp.maximum(h @ params["w2"].T + params["b2"], 0.0)
    h = jnp.maximum(h @ params["w3"].T + params["b3"], 0.0)
    return jnp.tanh(h @ params["w4"].T + params["b4"]) * max_actions


if __name__ == "__main__":
    # MountainCarContinuous-v0: n_states=2, n_actions=1
    n_states, n_actions, hidden = 2, 1, 32
    max_actions = 1.0

    key = jax.random.PRNGKey(0)
    key, kx_small, kx_big = jax.random.split(key, 3)
    params = init_actor_params(key, n_states, n_actions, hidden)
    w_slab, b_slab, ns, na = pack_actor_params(params)

    # Path 1: tiny batch (acting) -> gridless, everything VMEM-resident.
    x_small = jax.random.normal(kx_small, (8, n_states), dtype=jnp.float32)
    out_small = actor_forward(x_small, w_slab, b_slab, ns, na, max_actions)
    out_small = jax.block_until_ready(out_small)
    exp_small = ref_forward(x_small, params, max_actions)
    assert out_small.shape == (8, n_actions)
    assert jnp.allclose(out_small, exp_small, atol=1e-5, rtol=1e-5)

    # Path 2: larger batch (training / vectorized envs) -> batch-tiled grid
    # (tile = 128 lanes, weights resident, batch axis "parallel").
    x_big = jax.random.normal(kx_big, (300, n_states), dtype=jnp.float32)
    out_big = actor_forward(x_big, w_slab, b_slab, ns, na, max_actions, batch_tile=128)
    out_big = jax.block_until_ready(out_big)
    exp_big = ref_forward(x_big, params, max_actions)
    assert out_big.shape == (300, n_actions)
    assert jnp.allclose(out_big, exp_big, atol=1e-5, rtol=1e-5)

    print("KERNEL_OK")
</pallas_src>

<mosaic_0001>
module attributes {stable_mosaic.version = 11 : i64} {
  func.func @_actor_kernel(%arg0: memref<2x8xf32, #tpu.memory_space<vmem>>, %arg1: memref<4x32x32xf32, #tpu.memory_space<vmem>>, %arg2: memref<32x4xf32, #tpu.memory_space<vmem>>, %arg3: memref<1x8xf32, #tpu.memory_space<vmem>>) attributes {dimension_semantics = [], scalar_prefetch = 0 : i64, scratch_operands = 0 : i64, tpu.core_type = #tpu.core_type<tc>} {
    %c0 = arith.constant 0 : index
    %c0_0 = arith.constant 0 : index
    %0 = vector.load %arg0[%c0, %c0_0] : memref<2x8xf32, #tpu.memory_space<vmem>>, vector<2x8xf32>
    %c0_1 = arith.constant 0 : index
    %c0_2 = arith.constant 0 : index
    %c0_3 = arith.constant 0 : index
    %1 = vector.load %arg1[%c0_1, %c0_2, %c0_3] : memref<4x32x32xf32, #tpu.memory_space<vmem>>, vector<1x32x32xf32>
    %2 = vector.shape_cast %1 : vector<1x32x32xf32> to vector<32x32xf32>
    %3 = vector.extract_strided_slice %2 {offsets = [0, 0], sizes = [32, 1], strides = [1, 1]} : vector<32x32xf32> to vector<32x1xf32>
    %4 = vector.extract_strided_slice %0 {offsets = [0, 0], sizes = [1, 8], strides = [1, 1]} : vector<2x8xf32> to vector<1x8xf32>
    %5 = vector.broadcast %3 : vector<32x1xf32> to vector<32x8xf32>
    %6 = vector.broadcast %4 : vector<1x8xf32> to vector<32x8xf32>
    %7 = arith.mulf %5, %6 : vector<32x8xf32>
    %8 = vector.extract_strided_slice %2 {offsets = [0, 1], sizes = [32, 1], strides = [1, 1]} : vector<32x32xf32> to vector<32x1xf32>
    %9 = vector.extract_strided_slice %0 {offsets = [1, 0], sizes = [1, 8], strides = [1, 1]} : vector<2x8xf32> to vector<1x8xf32>
    %10 = vector.broadcast %8 : vector<32x1xf32> to vector<32x8xf32>
    %11 = vector.broadcast %9 : vector<1x8xf32> to vector<32x8xf32>
    %12 = arith.mulf %10, %11 : vector<32x8xf32>
    %13 = arith.addf %7, %12 : vector<32x8xf32>
    %c0_4 = arith.constant 0 : index
    %c0_5 = arith.constant 0 : index
    %14 = vector.load %arg2[%c0_4, %c0_5] : memref<32x4xf32, #tpu.memory_space<vmem>>, vector<32x1xf32>
    %15 = vector.broadcast %14 : vector<32x1xf32> to vector<32x8xf32>
    %16 = arith.addf %13, %15 : vector<32x8xf32>
    %cst = arith.constant 0.000000e+00 : f32
    %17 = vector.broadcast %cst : f32 to vector<32x8xf32>
    %18 = arith.maximumf %16, %17 : vector<32x8xf32>
    %c1 = arith.constant 1 : index
    %c0_6 = arith.constant 0 : index
    %c0_7 = arith.constant 0 : index
    %19 = vector.load %arg1[%c1, %c0_6, %c0_7] : memref<4x32x32xf32, #tpu.memory_space<vmem>>, vector<1x32x32xf32>
    %20 = vector.shape_cast %19 : vector<1x32x32xf32> to vector<32x32xf32>
    %cst_8 = arith.constant dense<0.000000e+00> : vector<32x8xf32>
    %21 = tpu.matmul %20, %18, %cst_8 {dimension_numbers = #tpu.dot_dimension_numbers<[1], [0], [0], [1], [0, 0, 1, 1], [], []>} : vector<32x32xf32>, vector<32x8xf32>, vector<32x8xf32> -> vector<32x8xf32>
    %c0_9 = arith.constant 0 : index
    %c1_10 = arith.constant 1 : index
    %22 = vector.load %arg2[%c0_9, %c1_10] : memref<32x4xf32, #tpu.memory_space<vmem>>, vector<32x1xf32>
    %23 = vector.broadcast %22 : vector<32x1xf32> to vector<32x8xf32>
    %24 = arith.addf %21, %23 : vector<32x8xf32>
    %cst_11 = arith.constant 0.000000e+00 : f32
    %25 = vector.broadcast %cst_11 : f32 to vector<32x8xf32>
    %26 = arith.maximumf %24, %25 : vector<32x8xf32>
    %c2 = arith.constant 2 : index
    %c0_12 = arith.constant 0 : index
    %c0_13 = arith.constant 0 : index
    %27 = vector.load %arg1[%c2, %c0_12, %c0_13] : memref<4x32x32xf32, #tpu.memory_space<vmem>>, vector<1x32x32xf32>
    %28 = vector.shape_cast %27 : vector<1x32x32xf32> to vector<32x32xf32>
    %cst_14 = arith.constant dense<0.000000e+00> : vector<32x8xf32>
    %29 = tpu.matmul %28, %26, %cst_14 {dimension_numbers = #tpu.dot_dimension_numbers<[1], [0], [0], [1], [0, 0, 1, 1], [], []>} : vector<32x32xf32>, vector<32x8xf32>, vector<32x8xf32> -> vector<32x8xf32>
    %c0_15 = arith.constant 0 : index
    %c2_16 = arith.constant 2 : index
    %30 = vector.load %arg2[%c0_15, %c2_16] : memref<32x4xf32, #tpu.memory_space<vmem>>, vector<32x1xf32>
    %31 = vector.broadcast %30 : vector<32x1xf32> to vector<32x8xf32>
    %32 = arith.addf %29, %31 : vector<32x8xf32>
    %cst_17 = arith.constant 0.000000e+00 : f32
    %33 = vector.broadcast %cst_17 : f32 to vector<32x8xf32>
    %34 = arith.maximumf %32, %33 : vector<32x8xf32>
    %c3 = arith.constant 3 : index
    %c0_18 = arith.constant 0 : index
    %c0_19 = arith.constant 0 : index
    %35 = vector.load %arg1[%c3, %c0_18, %c0_19] : memref<4x32x32xf32, #tpu.memory_space<vmem>>, vector<1x32x32xf32>
    %36 = vector.shape_cast %35 : vector<1x32x32xf32> to vector<32x32xf32>
    %37 = vector.extract_strided_slice %36 {offsets = [0, 0], sizes = [32, 1], strides = [1, 1]} : vector<32x32xf32> to vector<32x1xf32>
    %38 = vector.broadcast %37 : vector<32x1xf32> to vector<32x8xf32>
    %39 = arith.mulf %38, %34 : vector<32x8xf32>
    %cst_20 = arith.constant dense<0.000000e+00> : vector<8xf32>
    %40 = vector.multi_reduction <add>, %39, %cst_20 [0] : vector<32x8xf32> to vector<8xf32>
    %41 = vector.shape_cast %40 : vector<8xf32> to vector<1x8xf32>
    %c0_21 = arith.constant 0 : index
    %c3_22 = arith.constant 3 : index
    %42 = vector.load %arg2[%c0_21, %c3_22] : memref<32x4xf32, #tpu.memory_space<vmem>>, vector<1x1xf32>
    %43 = vector.broadcast %42 : vector<1x1xf32> to vector<1x8xf32>
    %44 = arith.addf %41, %43 : vector<1x8xf32>
    %45 = math.tanh %44 : vector<1x8xf32>
    %cst_23 = arith.constant 1.000000e+00 : f32
    %46 = vector.broadcast %cst_23 : f32 to vector<1x8xf32>
    %47 = arith.mulf %45, %46 : vector<1x8xf32>
    %c0_24 = arith.constant 0 : index
    %c0_25 = arith.constant 0 : index
    %48 = vector.load %arg3[%c0_24, %c0_25] : memref<1x8xf32, #tpu.memory_space<vmem>>, vector<1x8xf32>
    tpu.vector_store %arg3[%c0_24, %c0_25], %47 {strides = array<i32>} : memref<1x8xf32, #tpu.memory_space<vmem>>, vector<1x8xf32>,
    return
  }
}

</mosaic_0001>

<bundles_post_ra>
// kernel: tpu_custom_call.1
= control target key start
LH: loop header
LB: loop body
LE: loop exit
PB: predicated region body
PF: predicated region fallthrough
CT: control target
= control target key end

     0   :  { %8 = vsyncpa [#allocation3], 0  ;;  %s507_s0 = inlined_call_operand.vmem [shape: f32[2,8], index: 0, kind: input, shape index: {}]   ;;  %s508_s1 = inlined_call_operand.hbm [shape: f32[4,32,32], index: 1, kind: input, shape index: {}]   ;;  %s509_s2 = inlined_call_operand.vmem [shape: f32[32,4], index: 2, kind: input, shape index: {}]   ;;  %s510_s3 = inlined_call_operand.hbm [shape: f32[1,8], index: 3, kind: output, shape index: {}]  }
   0x1   :  { %9 = vsyncpa [#allocation4], 0  ;;  %s16_s14 = sshll.u32 %s508_s1, 4  ;;  %s418_s15 = smov [#allocation2]   ;;  %s17_s14 = int_to_ptr.hbm [resolvable:$true] %s16_s14 }
   0x2   :  { %s18_s16 = sshll.u32 %s418_s15, 4  ;;  %s419_s17 = smov 128   ;;  %s19_s16 = int_to_ptr.vmem [resolvable:$true] %s18_s16 }
   0x3   :  { %s420_s18 = smov 8  }
   0x4   :  { %24 = dma.hbm_to_vmem [thread:$0]  %s17_s14, 2048, %s19_s16, [#allocation3], %s419_s17, %s419_s17, %s420_s18  }
   0x5   :  { %414 = dma.done.wait [#allocation3], 2048  }
   0x6   :  { %415 = vsyncadd [#allocation3], 4294965248  ;;  %v421_v0 = vmov 0   ;;  %v35_v1 = vld [vmem:[#allocation2 + $0x18] sm:$0xff]  ;;  %v34_v2 = vld [vmem:[#allocation2 + $0x10] sm:$0xff]  ;;  %v422_v4 = vmov 1  }
   0x7   :  { %347 = vset.pattern.permute.xlu1 %v421_v0  ;;  %345 = vset.pattern.permute.xlu0 %v421_v0  ;;  %v33_v3 = vld [vmem:[#allocation2 + $0x8] sm:$0xff]  ;;  %v32_v5 = vld [vmem:[#allocation2] sm:$0xff]  ;;  %v455_v6 = vld [vmem:[%s509_s2 + $0x18] sm:$0xff]  ;;  %vm139_vm0 = vcmask 261120   ;;  %v423_v49 = vmov 2   ;;  %v424_v59 = vmov 3  }
   0x8   :  { %349 = vset.pattern.permute.xlu2 %v421_v0  ;;  %53 = vperm.xlu0 %345, %v35_v1   ;;  %v463_v7 = vld [vmem:[%s509_s2 + $0x10] sm:$0xff]  ;;  %v468_v8 = vld [vmem:[%s509_s2] sm:$0xff]  ;;  %v474_v9 = vld [vmem:[%s509_s2 + $0x8] sm:$0xff]  ;;  %vm280_vm1 = vcmask 64512   ;;  %s311_s5 = sshll.u32 %s510_s3, 4  ;;  %vm302_vm2 = vcmask 57344   ;;  %s312_s5 = int_to_ptr.hbm [resolvable:$true] %s311_s5 }
   0x9   :  { %48 = vperm.xlu1 %347, %v34_v2   ;;  %43 = vperm.xlu2 %349, %v33_v3   ;;  %v31_v16 = vld [vmem:[%s507_s0] sm:$0x3]  ;;  %v121_v45 = vld [vmem:[#allocation2 + $0x30] sm:$0xff]  ;;  %v122_v47 = vld [vmem:[#allocation2 + $0x38] sm:$0xff] }
   0xa   :  { %v77_v17 = vperm.slane %v31_v16, 1  ;;  %v56_v18 = vperm.slane %v31_v16, 0  ;;  %v119_v46 = vld [vmem:[#allocation2 + $0x20] sm:$0xff]  ;;  %v120_v48 = vld [vmem:[#allocation2 + $0x28] sm:$0xff]  ;;  %v254_v56 = vld [vmem:[#allocation2 + $0x70] sm:$0xff] }
   0xb   :  { %v253_v50 = vld [vmem:[#allocation2 + $0x68] sm:$0xff]  ;;  %v252_v53 = vld [vmem:[#allocation2 + $0x60] sm:$0xff]  ;;  %v255_v57 = vld [vmem:[#allocation2 + $0x78] sm:$0xff] }
  0x10   :  { %346 = vset.pattern.permute.xlu0 %v422_v4 }
  0x11   :  { %348 = vset.pattern.permute.xlu1 %v422_v4  ;;  %74 = vperm.xlu0 %346, %v35_v1  }
  0x12   :  { %70 = vperm.xlu1 %348, %v34_v2   ;;  %350 = vset.pattern.permute.xlu2 %v422_v4 }
  0x13   :  { %66 = vperm.xlu2 %350, %v33_v3  }
  0x19   :  { %62 = vperm.xlu0 %346, %v32_v5  }
  0x1a   :  { %351 = vset.pattern.permute.xlu1 %v421_v0 }
  0x1b   :  { %107 = vperm.xlu1 %351, %v455_v6   ;;  %352 = vset.pattern.permute.xlu2 %v421_v0 }
  0x1c   :  { %38 = vperm.xlu2 %352, %v32_v5  }
  0x21   :  { %353 = vset.pattern.permute.xlu0 %v421_v0 }
  0x22   :  { %92 = vperm.xlu0 %353, %v468_v8  }
  0x23   :  { %102 = vperm.xlu1 %351, %v463_v7  }
  0x24   :  { %97 = vperm.xlu2 %352, %v474_v9  }
  0x2a   :  { %356 = vset.pattern.permute.xlu0 %v423_v49 }
  0x2b   :  { %354 = vset.pattern.permute.xlu1 %v422_v4  ;;  %191 = vperm.xlu0 %356, %v468_v8  }
  0x2c   :  { %136 = vperm.xlu1 %354, %v455_v6   ;;  %355 = vset.pattern.permute.xlu2 %v422_v4 }
  0x2d   :  { %132 = vperm.xlu2 %355, %v463_v7  }
  0x33   :  { %360 = vset.pattern.permute.xlu0 %v421_v0 }
  0x34   :  { %128 = vperm.xlu1 %354, %v474_v9   ;;  %263 = vperm.xlu0 %360, %v253_v50  }
  0x35   :  { %124 = vperm.xlu2 %355, %v468_v8   ;;  %v186_v8 = vld [vmem:[#allocation2 + $0x40] sm:$0xff] }
  0x3c   :  { %357 = vset.pattern.permute.xlu1 %v423_v49  ;;  %363 = vset.pattern.permute.xlu0 %v424_v59 }
  0x3d   :  { %195 = vperm.xlu1 %357, %v474_v9   ;;  %358 = vset.pattern.permute.xlu2 %v423_v49  ;;  %v188_v9 = vld [vmem:[#allocation2 + $0x50] sm:$0xff] }
  0x3e   :  { %199 = vperm.xlu2 %358, %v463_v7  }
  0x45   :  { %203 = vperm.xlu1 %357, %v455_v6  }
  0x46   :  { %359 = vset.pattern.permute.xlu2 %v421_v0 }
  0x47   :  { %258 = vperm.xlu2 %359, %v252_v53  }
  0x4d   :  { %361 = vset.pattern.permute.xlu1 %v421_v0  ;;  %v294_v0 = vld [vmem:[%s509_s2] sm:$0x1]  ;;  %s425_s2 = smov [#allocation5]  }
  0x4e   :  { %268 = vperm.xlu1 %361, %v254_v56   ;;  %s309_s29 = sshll.u32 %s425_s2, 4  ;;  %s310_s29 = int_to_ptr.vmem [resolvable:$true] %s309_s29 }
  0x4f   :  { %273 = vperm.xlu2 %359, %v255_v57  }
  0x56   :  { %362 = vset.pattern.permute.xlu1 %v424_v59 }
  0x57   :  { %297 = vperm.xlu1 %362, %v294_v0  }
  0x63   :  { %v44_v10 = vpop.permute.xlu2 %43 }
  0x64   :  { %v58_v24 = vmul.f32 %v56_v18, %v44_v10  ;;  %v187_v10 = vld [vmem:[#allocation2 + $0x48] sm:$0xff] }
  0x6d   :  { %v67_v13 = vpop.permute.xlu2 %66 }
  0x6e   :  { %v79_v25 = vmul.f32 %v77_v17, %v67_v13 }
  0x70   :  { %v83_v30 = vadd.f32 %v79_v25, %v58_v24 }
  0x76   :  { %v39_v20 = vpop.permute.xlu2 %38 }
  0x77   :  { %v57_v31 = vmul.f32 %v56_v18, %v39_v20 }
  0x7a   :  { %v54_v12 = vpop.permute.xlu0 %53 }
  0x7b   :  { %v49_v11 = vpop.permute.xlu1 %48  ;;  %v60_v21 = vmul.f32 %v56_v18, %v54_v12 }
  0x7c   :  { %v59_v32 = vmul.f32 %v56_v18, %v49_v11  ;;  %v189_v11 = vld [vmem:[#allocation2 + $0x58] sm:$0xff] }
  0x7e   :  { %v98_v34 = vpop.permute.xlu2 %97 }
  0x7f   :  { %v111_v38 = vadd.f32 %v98_v34, %v83_v30 }
  0x81   :  { %v115_v43 = vmax.f32 %v111_v38, 0.0 }
  0x83   :  { %v75_v14 = vpop.permute.xlu0 %74 }
  0x84   :  { %v71_v15 = vpop.permute.xlu1 %70  ;;  %v81_v19 = vmul.f32 %v77_v17, %v75_v14 }
  0x85   :  { %v80_v28 = vmul.f32 %v77_v17, %v71_v15 }
  0x86   :  { %v85_v23 = vadd.f32 %v81_v19, %v60_v21 }
  0x87   :  { %v84_v35 = vadd.f32 %v80_v28, %v59_v32  ;;  %v133_v54 = vpop.permute.xlu2 %132 }
  0x8b   :  { %v63_v22 = vpop.permute.xlu0 %62 }
  0x8c   :  { %v78_v33 = vmul.f32 %v77_v17, %v63_v22 }
  0x8d   :  { %v108_v26 = vpop.permute.xlu1 %107 }
  0x8e   :  { %v113_v27 = vadd.f32 %v108_v26, %v85_v23  ;;  %v82_v40 = vadd.f32 %v78_v33, %v57_v31 }
  0x8f   :  { %v125_v1 = vpop.permute.xlu2 %124 }
  0x90   :  { %v117_v29 = vmax.f32 %v113_v27, 0.0 }
  0x92   :  { %164 = vmatpush.msra.mxu0 %v117_v29  ;;  %329 = vmatpush.msra.mxu2 %v117_v29 }
  0x94   :  { %v93_v37 = vpop.permute.xlu0 %92 }
  0x95   :  { %v103_v36 = vpop.permute.xlu1 %102  ;;  %v110_v42 = vadd.f32 %v93_v37, %v82_v40 }
  0x96   :  { %v112_v39 = vadd.f32 %v103_v36, %v84_v35 }
  0x97   :  { %v114_v44 = vmax.f32 %v110_v42, 0.0 }
  0x98   :  { %v116_v41 = vmax.f32 %v112_v39, 0.0  ;;  %v200_v13 = vpop.permute.xlu2 %199 }
  0x9a   :  { %165 = vmatpush.msra.mxu0 %v116_v41  ;;  %330 = vmatpush.msra.mxu2 %v116_v41 }
  0x9c   :  { %166 = vmatpush.msra.mxu0 %v115_v43  ;;  %331 = vmatpush.msra.mxu2 %v115_v43 }
  0x9d   :  { %v192_v15 = vpop.permute.xlu0 %191 }
  0x9e   :  { %167 = vmatpush.msra.mxu0 %v114_v44  ;;  %332 = vmatpush.msra.mxu2 %v114_v44  ;;  %v137_v51 = vpop.permute.xlu1 %136 }
  0x9f   :  { %323 = vmatmul.msk.f32.vlgmr.msra.gmra.mxu2 %vm139_vm0, %v121_v45  ;;  %321 = vmatmul.msk.f32.vlgmr.msra.gmra.mxu0 %vm139_vm0, %v119_v46 }
  0xa1   :  { %v259_v21 = vpop.permute.xlu2 %258 }
  0xa6   :  { %v129_v58 = vpop.permute.xlu1 %128  ;;  %v264_v24 = vpop.permute.xlu0 %263 }
  0xa7   :  { %324 = vmatmul.msk.f32.gmra.mxu2 %vm139_vm0, %v122_v47  ;;  %322 = vmatmul.msk.f32.gmra.mxu0 %vm139_vm0, %v120_v48 }
  0xa9   :  { %v274_v37 = vpop.permute.xlu2 %273 }
  0xaf   :  { %v196_v12 = vpop.permute.xlu1 %195 }
  0xb7   :  { %v204_v17 = vpop.permute.xlu1 %203 }
  0xc0   :  { %v269_v28 = vpop.permute.xlu1 %268 }
  0xc9   :  { %v298_v48 = vpop.permute.xlu1 %297 }
 0x11c   :  { %v169_v52 = vpop.f32.mrf.mxu0 }
 0x11d   :  { %v170_v5 = vadd.f32 %v169_v52, %v125_v1 }
 0x11f   :  { %v181_v7 = vmax.f32 %v170_v5, 0.0 }
 0x122   :  { %v175_v55 = vpop.f32.mrf.mxu2 }
 0x123   :  { %v176_v62 = vadd.f32 %v175_v55, %v133_v54 }
 0x124   :  { %v172_v60 = vpop.f32.mrf.mxu0 }
 0x125   :  { %v173_v2 = vadd.f32 %v172_v60, %v129_v58  ;;  %v183_v4 = vmax.f32 %v176_v62, 0.0 }
 0x127   :  { %v182_v6 = vmax.f32 %v173_v2, 0.0 }
 0x12a   :  { %v178_v61 = vpop.f32.mrf.mxu2 }
 0x12b   :  { %v179_v63 = vadd.f32 %v178_v61, %v137_v51 }
 0x12d   :  { %v184_v3 = vmax.f32 %v179_v63, 0.0 }
 0x12f   :  { %230 = vmatpush.msra.mxu1 %v184_v3  ;;  %333 = vmatpush.msra.mxu3 %v184_v3 }
 0x131   :  { %231 = vmatpush.msra.mxu1 %v183_v4  ;;  %334 = vmatpush.msra.mxu3 %v183_v4 }
 0x133   :  { %232 = vmatpush.msra.mxu1 %v182_v6  ;;  %335 = vmatpush.msra.mxu3 %v182_v6 }
 0x135   :  { %233 = vmatpush.msra.mxu1 %v181_v7  ;;  %336 = vmatpush.msra.mxu3 %v181_v7 }
 0x136   :  { %325 = vmatmul.msk.f32.vlgmr.msra.gmra.mxu1 %vm139_vm0, %v186_v8  ;;  %327 = vmatmul.msk.f32.vlgmr.msra.gmra.mxu3 %vm139_vm0, %v188_v9 }
 0x13e   :  { %326 = vmatmul.msk.f32.gmra.mxu1 %vm139_vm0, %v187_v10  ;;  %328 = vmatmul.msk.f32.gmra.mxu3 %vm139_vm0, %v189_v11 }
 0x1b3   :  { %v235_v14 = vpop.f32.mrf.mxu1 }
 0x1b4   :  { %v236_v16 = vadd.f32 %v235_v14, %v192_v15 }
 0x1b6   :  { %v247_v19 = vmax.f32 %v236_v16, 0.0 }
 0x1b8   :  { %v276_v25 = vmul.f32 %v259_v21, %v247_v19 }
 0x1b9   :  { %v241_v18 = vpop.f32.mrf.mxu3 }
 0x1ba   :  { %v242_v20 = vadd.f32 %v241_v18, %v200_v13  ;;  %v281_v31 = vsel %vm280_vm1, %v276_v25, 0.0 }
 0x1bb   :  { %v238_v22 = vpop.f32.mrf.mxu1 }
 0x1bc   :  { %v239_v23 = vadd.f32 %v238_v22, %v196_v12  ;;  %v249_v26 = vmax.f32 %v242_v20, 0.0 }
 0x1be   :  { %v248_v27 = vmax.f32 %v239_v23, 0.0  ;;  %v278_v32 = vmul.f32 %v269_v28, %v249_v26 }
 0x1c0   :  { %v277_v29 = vmul.f32 %v264_v24, %v248_v27  ;;  %v284_v38 = vsel %vm280_vm1, %v278_v32, 0.0 }
 0x1c1   :  { %v244_v30 = vpop.f32.mrf.mxu3 }
 0x1c2   :  { %v282_v33 = vsel %vm280_vm1, %v277_v29, 0.0  ;;  %v245_v34 = vadd.f32 %v244_v30, %v204_v17 }
 0x1c3   :  { %v283_v35 = vadd.f32 %v282_v33, %v281_v31 }
 0x1c4   :  { %v250_v36 = vmax.f32 %v245_v34, 0.0 }
 0x1c5   :  { %v285_v40 = vadd.f32 %v284_v38, %v283_v35 }
 0x1c6   :  { %v279_v39 = vmul.f32 %v274_v37, %v250_v36 }
 0x1c8   :  { %v286_v41 = vsel %vm280_vm1, %v279_v39, 0.0 }
 0x1c9   :  { %v287_v42 = vadd.f32 %v286_v41, %v285_v40 }
 0x1cb   :  { %v288_v43 = vrot.slane %v287_v42, 4 }
 0x1cd   :  { %v289_v44 = vadd.f32 %v288_v43, %v287_v42 }
 0x1cf   :  { %v290_v45 = vrot.slane %v289_v44, 2 }
 0x1d1   :  { %v291_v46 = vadd.f32 %v290_v45, %v289_v44 }
 0x1d3   :  { %v292_v47 = vrot.slane %v291_v46, 1 }
 0x1d5   :  { %v293_v49 = vadd.f32 %v292_v47, %v291_v46 }
 0x1d7   :  { %v300_v50 = vadd.f32 %v298_v48, %v293_v49 }
 0x1d9   :  { %364 = vtanh.f32 %v300_v50 }
 0x1df   :  { %v365_v51 = vpop.eup %364 }
 0x1e0   :  { %303 = vst.msk [vmem:[#allocation5] sm:$0x1] %vm302_vm2, %v365_v51 }
 0x1e1   :  { %314 = dma.vmem_to_hbm [thread:$0]  %s310_s29, 16, %s312_s5, [#allocation4]  }
 0x1e2   :  { %416 = dma.done.wait [#allocation4], 16  }
 0x1e3   :  { %417 = vsyncadd [#allocation4], 4294967280 }
 0x1e4   :  { %319 = vsyncpa [#allocation3], 1 }
 0x1e5   :  { %320 = vsyncpa [#allocation4], 1 }

</bundles_post_ra>
